<compile_context>
chip_gen: v5e
topology: v5e:2x2
jax: 0.10.0
libtpu: 0.0.40
codegen_flags: <defaults>
</compile_context>

<pallas_src>
import jax
import jax.numpy as jnp
from jax.experimental import pallas as pl
from jax.experimental.pallas import tpu as pltpu


def _round_up(x, m):
    return (x + m - 1) // m * m


def attention_kernel(src_ref, rel_ref, nbr_ref, mask_ref, cand_ref,
                     wn_ref, ws_ref, out_ref, sdq_ref):
    # src/rel: (bb, D) f32; nbr: (bb, N, 2D) bf16; mask: (bb, N) f32
    # cand: (bb, D, tc) bf16; wn/ws: (2D, D) bf16
    # out: (bb, tc) f32; sdq_ref: (bb, D) f32 scratch (persists across j)

    @pl.when(pl.program_id(1) == 0)
    def _():
        # --- attention half: computed once per batch tile ---
        src = src_ref[...]                                   # (bb, D) f32
        rel = rel_ref[...]                                   # (bb, D) f32
        mask = mask_ref[...]                                 # (bb, N) f32
        nbr = nbr_ref[...]                                   # (bb, N, 2D) bf16
        bb, n_nbr, d2 = nbr.shape
        d = d2 // 2

        # nbr_emb = cat(nbr_rel, nbr_ent, -1) @ W_n  -> one (bb*N, 2D)@(2D, D)
        nbr_emb = jnp.dot(nbr.reshape(bb * n_nbr, d2), wn_ref[...],
                          preferred_element_type=jnp.float32)
        nbr_emb = nbr_emb.reshape(bb, n_nbr, d)              # (bb, N, D) f32

        # attention scores over neighbors: broadcast-mul + lane reduce
        node_query = src * rel                               # (bb, D)
        nbr_scores = jnp.sum(node_query[:, None, :] * nbr_emb, axis=-1)
        nbr_scores = nbr_scores + (1.0 - mask) * (-1.0e7)

        # numerically-stable softmax; reciprocal on the EUP slot
        m = jnp.max(nbr_scores, axis=-1, keepdims=True)
        e = jnp.exp(nbr_scores - m)
        probs = e * pl.reciprocal(jnp.sum(e, axis=-1, keepdims=True),
                                  approx=True)

        # attention-weighted neighbor embedding
        attention_emb = jnp.sum(probs[..., None] * nbr_emb, axis=1)   # (bb, D)

        # output_emb = cat(node, attention_emb, -1) @ W_s
        concat = jnp.concatenate(
            [src, attention_emb], axis=-1).astype(jnp.bfloat16)       # (bb, 2D)
        source_vec = jnp.dot(concat, ws_ref[...],
                             preferred_element_type=jnp.float32)      # (bb, D)

        # source_dot_query, reused across candidate tiles
        sdq_ref[...] = source_vec * rel

    # --- candidate contraction (every grid step) ---
    # cand is (bb, D, tc) with the candidate axis lane-dense; contracting over
    # D is a sublane/XLU reduce.
    sdq = sdq_ref[...]                                       # (bb, D) f32
    cand = cand_ref[...].astype(jnp.float32)                 # (bb, D, tc)
    out_ref[...] = jnp.sum(sdq[:, :, None] * cand, axis=1)   # (bb, tc)


def attention_forward(src_emb, rel_emb, nbr_rel_emb, nbr_ent_emb, nbr_mask,
                      cand_emb, w_n, w_s, *, block_b=256, block_c=256):
    """Eval-mode forward of Attention. Returns (B, C) float32 scores."""
    B, N, D = nbr_rel_emb.shape
    C = cand_emb.shape[1]

    # Candidate tile (lane axis): multiple of 128, capped at block_c.
    tc = min(_round_up(block_c, 128), _round_up(max(C, 128), 128))
    C_pad = _round_up(max(C, tc), tc)

    # Batch tile: sublane-aligned, capped at block_b, and small enough that
    # the batch axis keeps several grid steps when B is large (overlap +
    # megacore split on v7x).
    B_pad8 = _round_up(B, 8)
    bb = min(_round_up(block_b, 8), max(8, _round_up((B_pad8 + 3) // 4, 8)))
    B_pad = _round_up(B, bb)

    def pad_b(x):
        if B_pad == B:
            return x
        pad = [(0, B_pad - B)] + [(0, 0)] * (x.ndim - 1)
        return jnp.pad(x, pad)

    src = pad_b(src_emb.astype(jnp.float32))
    rel = pad_b(rel_emb.astype(jnp.float32))
    mask = pad_b(nbr_mask.astype(jnp.float32))

    # One (B, N, 2D) bf16 neighbor-feature slab.
    nbr_cat = jnp.concatenate([nbr_rel_emb, nbr_ent_emb],
                              axis=-1).astype(jnp.bfloat16)           # (B, N, 2D)
    nbr_cat = pad_b(nbr_cat)

    # Candidates: transpose to D-sublane / C-lane layout, pad, ship as bf16.
    cand_t = jnp.transpose(cand_emb, (0, 2, 1)).astype(jnp.bfloat16)  # (B, D, C)
    cand_t = pad_b(cand_t)
    if C_pad != C:
        cand_t = jnp.pad(cand_t, ((0, 0), (0, 0), (0, C_pad - C)))

    # Single bf16 projection weights (resident in VMEM across the grid).
    wn = w_n.astype(jnp.bfloat16)                                     # (2D, D)
    ws = w_s.astype(jnp.bfloat16)                                     # (2D, D)

    grid = (B_pad // bb, C_pad // tc)

    out = pl.pallas_call(
        attention_kernel,
        out_shape=jax.ShapeDtypeStruct((B_pad, C_pad), jnp.float32),
        grid_spec=pltpu.PrefetchScalarGridSpec(
            num_scalar_prefetch=0,
            grid=grid,
            in_specs=[
                pl.BlockSpec((bb, D), lambda i, j: (i, 0)),          # src
                pl.BlockSpec((bb, D), lambda i, j: (i, 0)),          # rel
                pl.BlockSpec((bb, N, 2 * D), lambda i, j: (i, 0, 0)),  # nbr_cat
                pl.BlockSpec((bb, N), lambda i, j: (i, 0)),          # mask
                pl.BlockSpec((bb, D, tc), lambda i, j: (i, 0, j)),   # candidates
                pl.BlockSpec((2 * D, D), lambda i, j: (0, 0)),       # w_n
                pl.BlockSpec((2 * D, D), lambda i, j: (0, 0)),       # w_s
            ],
            out_specs=pl.BlockSpec((bb, tc), lambda i, j: (i, j)),
            scratch_shapes=[pltpu.VMEM((bb, D), jnp.float32)],       # sdq
        ),
        compiler_params=pltpu.CompilerParams(
            dimension_semantics=("parallel", "arbitrary"),
            vmem_limit_bytes=56 * 1024 * 1024,     # fits v7x 64 MiB w/ headroom
        ),
    )(src, rel, nbr_cat, mask, cand_t, wn, ws)

    return out[:B, :C]


def attention_reference(src_emb, rel_emb, nbr_rel_emb, nbr_ent_emb, nbr_mask,
                        cand_emb, w_n, w_s):
    """Pure-JAX f32 reference (mirrors the PyTorch eval path)."""
    nbr_cat = jnp.concatenate([nbr_rel_emb, nbr_ent_emb], axis=-1)   # (B, N, 2D)
    nbr_emb = jnp.einsum('bnk,kd->bnd', nbr_cat, w_n)                # (B, N, D)
    node_query = src_emb * rel_emb
    nbr_scores = jnp.einsum('bd,bnd->bn', node_query, nbr_emb)
    nbr_scores = nbr_scores + (1.0 - nbr_mask) * (-1.0e7)
    probs = jax.nn.softmax(nbr_scores, axis=-1)
    attention_emb = jnp.sum(probs[..., None] * nbr_emb, axis=1)
    concat_emb = jnp.concatenate([src_emb, attention_emb], axis=-1)
    source_vec = concat_emb @ w_s
    sdq = source_vec * rel_emb
    return jnp.einsum('bd,bcd->bc', sdq, cand_emb)


def xavier_uniform(key, shape):
    fan_out, fan_in = shape[0], shape[1]
    bound = (6.0 / (fan_in + fan_out)) ** 0.5
    return jax.random.uniform(key, shape, jnp.float32, -bound, bound)


if __name__ == "__main__":
    # Small synthetic configuration consistent with the module:
    ENT_VOCAB = 20           # train_graph.ent_vocab_size
    REL_VOCAB = 10           # train_graph.rel_vocab_size
    ENT_PAD = ENT_VOCAB - 1  # train_graph.ent_pad
    D = 32                   # dim
    B = 2                    # batch
    N = 8                    # neighbors per source
    C = 8                    # candidates per example

    root = jax.random.PRNGKey(0)
    k_ent, k_rel, k_wn, k_ws, k_s, k_r, k_cand, k_nr, k_ne = jax.random.split(root, 9)

    # Parameters (deterministic xavier-uniform init, as in __init__)
    entities_emb = xavier_uniform(k_ent, (ENT_VOCAB, D))
    relations_emb = xavier_uniform(k_rel, (REL_VOCAB, D))
    attention_emb_n = xavier_uniform(k_wn, (2 * D, D))
    attention_emb_s = xavier_uniform(k_ws, (2 * D, D))

    # Inputs: s, nbrs_s, r, candidates  (labels / nbrs_candidates unused in eval)
    s = jax.random.randint(k_s, (B,), 0, ENT_VOCAB)
    r = jax.random.randint(k_r, (B,), 0, REL_VOCAB)
    candidates = jax.random.randint(k_cand, (B, C), 0, ENT_VOCAB)
    nbrs_rel_ids = jax.random.randint(k_nr, (B, N), 0, REL_VOCAB)
    nbrs_ent_ids = jax.random.randint(k_ne, (B, N), 0, ENT_VOCAB)
    # force a couple of padded neighbors so the mask path is exercised
    nbrs_ent_ids = nbrs_ent_ids.at[:, -2:].set(ENT_PAD)

    # Plain-JAX glue: embedding gathers + pad mask (float32)
    source_emb = jnp.take(entities_emb, s, axis=0)                 # (B, D)
    relation_emb = jnp.take(relations_emb, r, axis=0)              # (B, D)
    candidates_emb = jnp.take(entities_emb, candidates, axis=0)    # (B, C, D)
    nbrs_rel_emb = jnp.take(relations_emb, nbrs_rel_ids, axis=0)   # (B, N, D)
    nbrs_ent_emb = jnp.take(entities_emb, nbrs_ent_ids, axis=0)    # (B, N, D)
    mask_nbrs_s = (nbrs_ent_ids != ENT_PAD).astype(jnp.float32)    # (B, N)

    scores = attention_forward(source_emb, relation_emb, nbrs_rel_emb,
                               nbrs_ent_emb, mask_nbrs_s, candidates_emb,
                               attention_emb_n, attention_emb_s)
    scores = jax.block_until_ready(scores)
    assert scores.shape == (B, C) and scores.dtype == jnp.float32

    # Correctness check vs f32 reference (loose tolerance: bf16 activations /
    # weights on the MXU + approx reciprocal in the softmax).
    ref = attention_reference(source_emb, relation_emb, nbrs_rel_emb,
                              nbrs_ent_emb, mask_nbrs_s, candidates_emb,
                              attention_emb_n, attention_emb_s)
    max_err = float(jnp.max(jnp.abs(scores - ref)))
    assert max_err < 5e-2, f"max abs error {max_err} too large"
    print("KERNEL_OK")
</pallas_src>

<mosaic_0001>
module attributes {stable_mosaic.version = 11 : i64} {
  func.func @attention_kernel(%arg0: i32, %arg1: i32, %arg2: memref<8x32xf32, #tpu.memory_space<vmem>>, %arg3: memref<8x32xf32, #tpu.memory_space<vmem>>, %arg4: memref<8x8x64xbf16, #tpu.memory_space<vmem>>, %arg5: memref<8x8xf32, #tpu.memory_space<vmem>>, %arg6: memref<8x32x128xbf16, #tpu.memory_space<vmem>>, %arg7: memref<64x32xbf16, #tpu.memory_space<vmem>>, %arg8: memref<64x32xbf16, #tpu.memory_space<vmem>>, %arg9: memref<8x128xf32, #tpu.memory_space<vmem>>, %arg10: memref<8x32xf32, #tpu.memory_space<vmem>>) attributes {dimension_semantics = [#tpu.dimension_semantics<parallel>, #tpu.dimension_semantics<arbitrary>], iteration_bounds = array<i64: 1, 1>, scalar_prefetch = 0 : i64, scratch_operands = 1 : i64, tpu.core_type = #tpu.core_type<tc>, window_params = [{transform_indices = @transform_0, window_bounds = array<i64: 8, 32>}, {transform_indices = @transform_1, window_bounds = array<i64: 8, 32>}, {transform_indices = @transform_2, window_bounds = array<i64: 8, 8, 64>}, {transform_indices = @transform_3, window_bounds = array<i64: 8, 8>}, {transform_indices = @transform_4, window_bounds = array<i64: 8, 32, 128>}, {pipeline_mode = #tpu.pipeline_mode<synchronous>, transform_indices = @transform_5, window_bounds = array<i64: 64, 32>}, {pipeline_mode = #tpu.pipeline_mode<synchronous>, transform_indices = @transform_6, window_bounds = array<i64: 64, 32>}, {transform_indices = @transform_7, window_bounds = array<i64: 8, 128>}]} {
    %c0_i32 = arith.constant 0 : i32
    %0 = arith.cmpi eq, %arg1, %c0_i32 : i32
    %1 = arith.extui %0 : i1 to i32
    %c0_i32_0 = arith.constant 0 : i32
    %2 = arith.cmpi ne, %1, %c0_i32_0 : i32
    scf.if %2 {
      %c0_7 = arith.constant 0 : index
      %c0_8 = arith.constant 0 : index
      %11 = vector.load %arg2[%c0_7, %c0_8] : memref<8x32xf32, #tpu.memory_space<vmem>>, vector<8x32xf32>
      %c0_9 = arith.constant 0 : index
      %c0_10 = arith.constant 0 : index
      %12 = vector.load %arg3[%c0_9, %c0_10] : memref<8x32xf32, #tpu.memory_space<vmem>>, vector<8x32xf32>
      %c0_11 = arith.constant 0 : index
      %c0_12 = arith.constant 0 : index
      %13 = vector.load %arg5[%c0_11, %c0_12] : memref<8x8xf32, #tpu.memory_space<vmem>>, vector<8x8xf32>
      %c0_13 = arith.constant 0 : index
      %c0_14 = arith.constant 0 : index
      %c0_15 = arith.constant 0 : index
      %14 = vector.load %arg4[%c0_13, %c0_14, %c0_15] : memref<8x8x64xbf16, #tpu.memory_space<vmem>>, vector<8x8x64xbf16>
      %15 = vector.shape_cast %14 : vector<8x8x64xbf16> to vector<64x64xbf16>
      %c0_16 = arith.constant 0 : index
      %c0_17 = arith.constant 0 : index
      %16 = vector.load %arg7[%c0_16, %c0_17] : memref<64x32xbf16, #tpu.memory_space<vmem>>, vector<64x32xbf16>
      %cst_18 = arith.constant dense<0.000000e+00> : vector<64x32xf32>
      %17 = tpu.matmul %15, %16, %cst_18 {dimension_numbers = #tpu.dot_dimension_numbers<[1], [0], [0], [1], [0, 0, 1, 1], [], []>} : vector<64x64xbf16>, vector<64x32xbf16>, vector<64x32xf32> -> vector<64x32xf32>
      %18 = vector.shape_cast %17 : vector<64x32xf32> to vector<8x8x32xf32>
      %19 = arith.mulf %11, %12 : vector<8x32xf32>
      %20 = vector.shape_cast %19 : vector<8x32xf32> to vector<8x1x32xf32>
      %21 = vector.broadcast %20 : vector<8x1x32xf32> to vector<8x8x32xf32>
      %22 = arith.mulf %21, %18 : vector<8x8x32xf32>
      %cst_19 = arith.constant dense<0.000000e+00> : vector<8x8xf32>
      %23 = vector.multi_reduction <add>, %22, %cst_19 [2] : vector<8x8x32xf32> to vector<8x8xf32>
      %cst_20 = arith.constant 1.000000e+00 : f32
      %24 = vector.broadcast %cst_20 : f32 to vector<8x8xf32>
      %25 = arith.subf %24, %13 : vector<8x8xf32>
      %cst_21 = arith.constant -1.000000e+07 : f32
      %26 = vector.broadcast %cst_21 : f32 to vector<8x8xf32>
      %27 = arith.mulf %25, %26 : vector<8x8xf32>
      %28 = arith.addf %23, %27 : vector<8x8xf32>
      %cst_22 = arith.constant dense<0xFF800000> : vector<8xf32>
      %29 = vector.multi_reduction <maximumf>, %28, %cst_22 [1] : vector<8x8xf32> to vector<8xf32>
      %30 = vector.shape_cast %29 : vector<8xf32> to vector<8x1xf32>
      %31 = vector.broadcast %30 : vector<8x1xf32> to vector<8x8xf32>
      %32 = arith.subf %28, %31 : vector<8x8xf32>
      %33 = math.exp %32 : vector<8x8xf32>
      %cst_23 = arith.constant dense<0.000000e+00> : vector<8xf32>
      %34 = vector.multi_reduction <add>, %33, %cst_23 [1] : vector<8x8xf32> to vector<8xf32>
      %35 = vector.shape_cast %34 : vector<8xf32> to vector<8x1xf32>
      %36 = tpu.reciprocal %35 {approx = true} : vector<8x1xf32> -> vector<8x1xf32>
      %37 = vector.broadcast %36 : vector<8x1xf32> to vector<8x8xf32>
      %38 = arith.mulf %33, %37 : vector<8x8xf32>
      %39 = vector.shape_cast %38 : vector<8x8xf32> to vector<8x8x1xf32>
      %40 = vector.broadcast %39 : vector<8x8x1xf32> to vector<8x8x32xf32>
      %41 = arith.mulf %40, %18 : vector<8x8x32xf32>
      %cst_24 = arith.constant dense<0.000000e+00> : vector<8x32xf32>
      %42 = vector.multi_reduction <add>, %41, %cst_24 [1] : vector<8x8x32xf32> to vector<8x32xf32>
      %43 = tpu.concatenate %11, %42 in 1 : vector<8x32xf32>, vector<8x32xf32> -> vector<8x64xf32>
      %44 = arith.truncf %43 : vector<8x64xf32> to vector<8x64xbf16>
      %c0_25 = arith.constant 0 : index
      %c0_26 = arith.constant 0 : index
      %45 = vector.load %arg8[%c0_25, %c0_26] : memref<64x32xbf16, #tpu.memory_space<vmem>>, vector<64x32xbf16>
      %cst_27 = arith.constant dense<0.000000e+00> : vector<8x32xf32>
      %46 = tpu.matmul %44, %45, %cst_27 {dimension_numbers = #tpu.dot_dimension_numbers<[1], [0], [0], [1], [0, 0, 1, 1], [], []>} : vector<8x64xbf16>, vector<64x32xbf16>, vector<8x32xf32> -> vector<8x32xf32>
      %47 = arith.mulf %46, %12 : vector<8x32xf32>
      %c0_28 = arith.constant 0 : index
      %c0_29 = arith.constant 0 : index
      %48 = vector.load %arg10[%c0_28, %c0_29] : memref<8x32xf32, #tpu.memory_space<vmem>>, vector<8x32xf32>
      tpu.vector_store %arg10[%c0_28, %c0_29], %47 {strides = array<i32>} : memref<8x32xf32, #tpu.memory_space<vmem>>, vector<8x32xf32>,
    } else {
    }
    %c0 = arith.constant 0 : index
    %c0_1 = arith.constant 0 : index
    %3 = vector.load %arg10[%c0, %c0_1] : memref<8x32xf32, #tpu.memory_space<vmem>>, vector<8x32xf32>
    %c0_2 = arith.constant 0 : index
    %c0_3 = arith.constant 0 : index
    %c0_4 = arith.constant 0 : index
    %4 = vector.load %arg6[%c0_2, %c0_3, %c0_4] : memref<8x32x128xbf16, #tpu.memory_space<vmem>>, vector<8x32x128xbf16>
    %5 = arith.extf %4 : vector<8x32x128xbf16> to vector<8x32x128xf32>
    %6 = vector.shape_cast %3 : vector<8x32xf32> to vector<8x32x1xf32>
    %7 = vector.broadcast %6 : vector<8x32x1xf32> to vector<8x32x128xf32>
    %8 = arith.mulf %7, %5 : vector<8x32x128xf32>
    %cst = arith.constant dense<0.000000e+00> : vector<8x128xf32>
    %9 = vector.multi_reduction <add>, %8, %cst [1] : vector<8x32x128xf32> to vector<8x128xf32>
    %c0_5 = arith.constant 0 : index
    %c0_6 = arith.constant 0 : index
    %10 = vector.load %arg9[%c0_5, %c0_6] : memref<8x128xf32, #tpu.memory_space<vmem>>, vector<8x128xf32>
    tpu.vector_store %arg9[%c0_5, %c0_6], %9 {strides = array<i32>} : memref<8x128xf32, #tpu.memory_space<vmem>>, vector<8x128xf32>,
    return
  }
  func.func @transform_0(%arg0: i32, %arg1: i32) -> (i32, i32) {
    %c0_i32 = arith.constant 0 : i32
    %c0_i32_0 = arith.constant 0 : i32
    return %arg0, %c0_i32 : i32, i32
  }
  func.func @transform_1(%arg0: i32, %arg1: i32) -> (i32, i32) {
    %c0_i32 = arith.constant 0 : i32
    %c0_i32_0 = arith.constant 0 : i32
    return %arg0, %c0_i32 : i32, i32
  }
  func.func @transform_2(%arg0: i32, %arg1: i32) -> (i32, i32, i32) {
    %c0_i32 = arith.constant 0 : i32
    %c0_i32_0 = arith.constant 0 : i32
    %c0_i32_1 = arith.constant 0 : i32
    return %arg0, %c0_i32, %c0_i32_0 : i32, i32, i32
  }
  func.func @transform_3(%arg0: i32, %arg1: i32) -> (i32, i32) {
    %c0_i32 = arith.constant 0 : i32
    %c0_i32_0 = arith.constant 0 : i32
    return %arg0, %c0_i32 : i32, i32
  }
  func.func @transform_4(%arg0: i32, %arg1: i32) -> (i32, i32, i32) {
    %c0_i32 = arith.constant 0 : i32
    %c0_i32_0 = arith.constant 0 : i32
    return %arg0, %c0_i32, %arg1 : i32, i32, i32
  }
  func.func @transform_5(%arg0: i32, %arg1: i32) -> (i32, i32) {
    %c0_i32 = arith.constant 0 : i32
    %c0_i32_0 = arith.constant 0 : i32
    %c0_i32_1 = arith.constant 0 : i32
    return %c0_i32, %c0_i32_0 : i32, i32
  }
  func.func @transform_6(%arg0: i32, %arg1: i32) -> (i32, i32) {
    %c0_i32 = arith.constant 0 : i32
    %c0_i32_0 = arith.constant 0 : i32
    %c0_i32_1 = arith.constant 0 : i32
    return %c0_i32, %c0_i32_0 : i32, i32
  }
  func.func @transform_7(%arg0: i32, %arg1: i32) -> (i32, i32) {
    %c0_i32 = arith.constant 0 : i32
    return %arg0, %arg1 : i32, i32
  }
}

</mosaic_0001>

<bundles_post_ra>
// kernel: tpu_custom_call.1
= control target key start
LH: loop header
LB: loop body
LE: loop exit
PB: predicated region body
PF: predicated region fallthrough
CT: control target
= control target key end

     0   :  { %12 = vsyncpa [#allocation4], 0  ;;  %s1607_s0 = inlined_call_operand.vmem [shape: f32[8,32], index: 0, kind: input, shape index: {}]   ;;  %s1608_s1 = inlined_call_operand.vmem [shape: f32[8,32], index: 1, kind: input, shape index: {}]   ;;  %s1609_s2 = inlined_call_operand.vmem [shape: bf16[8,8,64], index: 2, kind: input, shape index: {}]   ;;  %s1610_s3 = inlined_call_operand.vmem [shape: f32[8,8], index: 3, kind: input, shape index: {}]   ;;  %s1611_s4 = inlined_call_operand.hbm [shape: bf16[8,32,128], index: 4, kind: input, shape index: {}]   ;;  %s1612_s5 = inlined_call_operand.vmem [shape: bf16[64,32], index: 5, kind: input, shape index: {}]   ;;  %s1613_s6 = inlined_call_operand.vmem [shape: bf16[64,32], index: 6, kind: input, shape index: {}]   ;;  %s1614_s7 = inlined_call_operand.hbm [shape: f32[8,128], index: 7, kind: output, shape index: {}]  }
   0x1   :  { %13 = vsyncpa [#allocation5], 0  ;;  %s26_s26 = sshll.u32 %s1611_s4, 4  ;;  %s1307_s27 = smov [#allocation3]   ;;  %s27_s26 = int_to_ptr.hbm [resolvable:$true] %s26_s26 }
   0x2   :  { %s28_s28 = sshll.u32 %s1307_s27, 4  ;;  %s1308_s29 = smov 64   ;;  %s29_s28 = int_to_ptr.vmem [resolvable:$true] %s28_s28 }
   0x3   :  { %s1309_s30 = smov 4  }
   0x4   :  { %34 = dma.hbm_to_vmem [thread:$0]  %s27_s26, 2048, %s29_s28, [#allocation4], %s1308_s29, %s1308_s29, %s1309_s30  }
   0x5   :  { %1303 = dma.done.wait [#allocation4], 2048  }
   0x6   :  { %1304 = vsyncadd [#allocation4], 4294965248  ;;  %v1109_v0 = vld [vmem:[%s1612_s5 + $0x18] sm:$0xff]  ;;  %v1108_v1 = vld [vmem:[%s1612_s5 + $0x10] sm:$0xff]  ;;  %v215_v2 = vlaneseq  ;;  %vm111_vm0 = vcmask 523264   ;;  %vm186_vm1 = vcmask 261120  }
   0x7   :  { %128 = vmatpush.bf16.msra.mxu0 %v1109_v0  ;;  %1193 = vmatpush.bf16.msra.mxu2 %v1109_v0  ;;  %v50_v3 = vld [vmem:[%s1610_s3] sm:$0xff]  ;;  %v1107_v6 = vld [vmem:[%s1612_s5 + $0x8] sm:$0xff]  ;;  %v1104_v14 = vld [vmem:[%s1609_s2 + $0x10] sm:$0xff]  ;;  %vm328_vm2 = vcmask 1041409   ;;  %vm330_vm3 = vcmask 1042434   ;;  %vm332_vm4 = vcmask 1043459  }
   0x8   :  { %1194 = vmatpush.bf16.msra.mxu3 %v1109_v0  ;;  %v211_v4 = vsub.f32 1.0, %v50_v3  ;;  %v1366_v5 = vshrl.u32 %v215_v2, 7  ;;  %v1106_v8 = vld [vmem:[%s1612_s5] sm:$0xff]  ;;  %v1103_v13 = vld [vmem:[%s1609_s2 + $0x8] sm:$0xff]  ;;  %v1105_v18 = vld [vmem:[%s1609_s2 + $0x18] sm:$0xff]  ;;  %v1310_v0 = vmov 0  }
   0x9   :  { %v1102_v12 = vld [vmem:[%s1609_s2] sm:$0xff]  ;;  %vm334_vm5 = vcmask 1044484   ;;  %vm336_vm6 = vcmask 1045509   ;;  %vm338_vm7 = vcmask 1046534   ;;  %vm340_vm8 = vcmask 1047559   ;;  %s1311_s30 = smov 32  }
   0xa   :  { %1208 = vset.pattern.permute.xlu2 %v1366_v5  ;;  %v212_v7 = vmul.f32 -10000000.0, %v211_v4  ;;  %1207 = vset.pattern.permute.xlu1 %v1366_v5  ;;  %v1396_v21 = vld [vmem:[%s1607_s0] sm:$0xff]  ;;  %vm343_vm9 = vcmask 64512   ;;  %s1039_s12 = sshll.u32 %s1614_s7, 4  ;;  %s1040_s12 = int_to_ptr.hbm [resolvable:$true] %s1039_s12 }
   0xb   :  { %129 = vmatpush.bf16.msra.mxu0 %v1108_v1  ;;  %1195 = vmatpush.bf16.msra.mxu2 %v1108_v1  ;;  %v1401_v22 = vld [vmem:[%s1608_s1] sm:$0xff] }
   0xc   :  { %1196 = vmatpush.bf16.msra.mxu3 %v1108_v1  ;;  %1209 = vset.pattern.permute.xlu0 %v1366_v5  ;;  %v221_v9 = vperm.slane %v212_v7, 1  ;;  %v214_v10 = vperm.slane %v212_v7, 0  ;;  %v228_v11 = vperm.slane %v212_v7, 2  ;;  %v235_v15 = vperm.slane %v212_v7, 3 }
   0xd   :  { %v263_v16 = vperm.slane %v212_v7, 7  ;;  %v242_v17 = vperm.slane %v212_v7, 4  ;;  %v249_v19 = vperm.slane %v212_v7, 5  ;;  %v256_v20 = vperm.slane %v212_v7, 6 }
   0xe   :  { %v153_v23 = vmul.f32 %v1401_v22, %v1396_v21 }
   0xf   :  { %130 = vmatpush.bf16.msra.mxu0 %v1107_v6  ;;  %1197 = vmatpush.bf16.msra.mxu2 %v1107_v6 }
  0x10   :  { %1198 = vmatpush.bf16.msra.mxu3 %v1107_v6  ;;  %v162_v24 = vperm.slane %v153_v23, 0  ;;  %v156_v25 = vrot.slane %v153_v23, 2  ;;  %v155_v28 = vrot.slane %v153_v23, 1  ;;  %v158_v31 = vrot.slane %v153_v23, 4 }
  0x11   :  { %v157_v36 = vrot.slane %v153_v23, 3  ;;  %v159_v38 = vrot.slane %v153_v23, 5  ;;  %v160_v50 = vrot.slane %v153_v23, 6  ;;  %v161_v57 = vrot.slane %v153_v23, 7 }
  0x12   :  { %226 = vperm.xlu2 %1208, %v221_v9   ;;  %219 = vperm.xlu1 %1207, %v214_v10   ;;  %v164_v30 = vperm.slane %v156_v25, 0  ;;  %v163_v32 = vperm.slane %v155_v28, 0  ;;  %v166_v39 = vperm.slane %v158_v31, 0 }
  0x13   :  { %131 = vmatpush.bf16.msra.mxu0 %v1106_v8  ;;  %1199 = vmatpush.bf16.msra.mxu2 %v1106_v8  ;;  %v165_v43 = vperm.slane %v157_v36, 0  ;;  %v167_v44 = vperm.slane %v159_v38, 0  ;;  %v168_v54 = vperm.slane %v160_v50, 0  ;;  %v169_v59 = vperm.slane %v161_v57, 0 }
  0x14   :  { %1200 = vmatpush.bf16.msra.mxu3 %v1106_v8  ;;  %233 = vperm.xlu0 %1209, %v228_v11  }
  0x16   :  { %1081 = vmatmul.msk.bf16.vlgmr.msra.gmra.mxu0 %vm111_vm0, %v1102_v12  ;;  %1082 = vmatmul.msk.bf16.vlgmr.msra.gmra.mxu2 %vm111_vm0, %v1103_v13 }
  0x17   :  { %1083 = vmatmul.msk.bf16.vlgmr.msra.gmra.mxu3 %vm111_vm0, %v1104_v14 }
  0x1a   :  { %240 = vperm.xlu2 %1208, %v235_v15   ;;  %268 = vperm.xlu1 %1207, %v263_v16  }
  0x1c   :  { %1211 = vset.pattern.permute.xlu0 %v1310_v0 }
  0x22   :  { %247 = vperm.xlu2 %1208, %v242_v17   ;;  %1212 = vset.pattern.permute.xlu1 %v1310_v0 }
  0x27   :  { %1084 = vmatmul.msk.bf16.gmra.mxu3 %vm111_vm0, %v1105_v18 }
  0x2a   :  { %254 = vperm.xlu2 %1208, %v249_v19  }
  0x32   :  { %261 = vperm.xlu2 %1208, %v256_v20  }
  0x3a   :  { %1210 = vset.pattern.permute.xlu2 %v1310_v0 }
  0x6c   :  { %v227_v63 = vpop.permute.xlu2 %226 }
  0x74   :  { %v241_v1 = vpop.permute.xlu2 %240 }
  0x7c   :  { %v248_v3 = vpop.permute.xlu2 %247 }
  0x84   :  { %v220_v4 = vpop.permute.xlu1 %219  ;;  %v255_v7 = vpop.permute.xlu2 %254 }
  0x86   :  { %v234_v6 = vpop.permute.xlu0 %233 }
  0x8c   :  { %v269_v8 = vpop.permute.xlu1 %268  ;;  %v262_v11 = vpop.permute.xlu2 %261 }
  0x93   :  { %v1405_v26 = vpop.f32.mrf.mxu0 }
  0x94   :  { %v178_v27 = vmul.f32 %v162_v24, %v1405_v26 }
  0x96   :  { %v187_v29 = vsel %vm186_vm1, %v178_v27, 0.0 }
  0x97   :  { %188 = vadd.xlane.f32.xlu0 %v187_v29 }
  0x99   :  { %v1409_v33 = vpop.f32.mrf.mxu2 }
  0x9a   :  { %v180_v34 = vmul.f32 %v164_v30, %v1409_v33  ;;  %v1412_v35 = vpop.f32.mrf.mxu3 }
  0x9b   :  { %v1414_v37 = vpop.f32.mrf.mxu0  ;;  %v182_v45 = vmul.f32 %v166_v39, %v1412_v35 }
  0x9c   :  { %v179_v40 = vmul.f32 %v163_v32, %v1414_v37  ;;  %v193_v41 = vsel %vm186_vm1, %v180_v34, 0.0  ;;  %v1450_v34 = vand.u32 127, %v215_v2 }
  0x9d   :  { %194 = vadd.xlane.f32.xlu1 %v193_v41  ;;  %v199_v52 = vsel %vm186_vm1, %v182_v45, 0.0 }
  0x9e   :  { %v190_v42 = vsel %vm186_vm1, %v179_v40, 0.0 }
  0x9f   :  { %191 = vadd.xlane.f32.xlu0 %v190_v42 }
  0xa1   :  { %v1420_v46 = vpop.f32.mrf.mxu2 }
  0xa2   :  { %v181_v47 = vmul.f32 %v165_v43, %v1420_v46  ;;  %v1423_v48 = vpop.f32.mrf.mxu3 }
  0xa3   :  { %v183_v49 = vmul.f32 %v167_v44, %v1423_v48 }
  0xa4   :  { %v196_v51 = vsel %vm186_vm1, %v181_v47, 0.0 }
  0xa5   :  { %197 = vadd.xlane.f32.xlu2 %v196_v51  ;;  %200 = vadd.xlane.f32.xlu1 %v199_v52  ;;  %v202_v53 = vsel %vm186_vm1, %v183_v49, 0.0 }
  0xa7   :  { %203 = vadd.xlane.f32.xlu0 %v202_v53 }
  0xaa   :  { %v1429_v55 = vpop.f32.mrf.mxu3 }
  0xab   :  { %v184_v56 = vmul.f32 %v168_v54, %v1429_v55 }
  0xad   :  { %v205_v58 = vsel %vm186_vm1, %v184_v56, 0.0 }
  0xae   :  { %206 = vadd.xlane.f32.xlu1 %v205_v58 }
  0xb2   :  { %v1433_v60 = vpop.f32.mrf.mxu3 }
  0xb3   :  { %v185_v61 = vmul.f32 %v169_v59, %v1433_v60 }
  0xb5   :  { %v208_v62 = vsel %vm186_vm1, %v185_v61, 0.0 }
  0xb6   :  { %209 = vadd.xlane.f32.xlu1 %v208_v62 }
 0x10a   :  { %v189_v9 = vpop.xlane.xlu0 %188 }
 0x10b   :  { %v278_v10 = vadd.f32 %v220_v4, %v189_v9 }
 0x10d   :  { %295 = vperm.xlu2 %1210, %v278_v10  }
 0x110   :  { %v195_v12 = vpop.xlane.xlu1 %194 }
 0x111   :  { %v1437_v14 = vadd.f32 %v234_v6, %v195_v12 }
 0x112   :  { %v192_v13 = vpop.xlane.xlu0 %191 }
 0x113   :  { %v279_v15 = vadd.f32 %v227_v63, %v192_v13 }
 0x115   :  { %301 = vperm.xlu2 %1210, %v1437_v14   ;;  %298 = vperm.xlu0 %1211, %v279_v15  }
 0x118   :  { %v198_v16 = vpop.xlane.xlu2 %197  ;;  %v201_v17 = vpop.xlane.xlu1 %200 }
 0x119   :  { %v1440_v18 = vadd.f32 %v248_v3, %v201_v17  ;;  %v281_v19 = vadd.f32 %v241_v1, %v198_v16 }
 0x11a   :  { %v204_v20 = vpop.xlane.xlu0 %203 }
 0x11b   :  { %307 = vperm.xlu1 %1212, %v1440_v18   ;;  %v283_v25 = vadd.f32 %v255_v7, %v204_v20 }
 0x11d   :  { %304 = vperm.xlu2 %1210, %v281_v19  }
 0x121   :  { %v207_v23 = vpop.xlane.xlu1 %206 }
 0x122   :  { %v1443_v24 = vadd.f32 %v262_v11, %v207_v23 }
 0x124   :  { %313 = vperm.xlu1 %1212, %v1443_v24  }
 0x125   :  { %310 = vperm.xlu2 %1210, %v283_v25  }
 0x129   :  { %v210_v27 = vpop.xlane.xlu1 %209 }
 0x12a   :  { %v1446_v28 = vadd.f32 %v269_v8, %v210_v27 }
 0x12d   :  { %316 = vperm.xlu2 %1210, %v1446_v28  }
 0x167   :  { %v296_v29 = vpop.permute.xlu2 %295 }
 0x168   :  { %v320_v39 = vperm.slane %v296_v29, %v1450_v34 }
 0x16f   :  { %v302_v30 = vpop.permute.xlu2 %301 }
 0x170   :  { %v322_v42 = vperm.slane %v302_v30, %v1450_v34 }
 0x177   :  { %v305_v31 = vpop.permute.xlu2 %304 }
 0x178   :  { %v323_v2 = vperm.slane %v305_v31, %v1450_v34 }
 0x17f   :  { %v311_v38 = vpop.permute.xlu2 %310 }
 0x180   :  { %v325_v50 = vperm.slane %v311_v38, %v1450_v34 }
 0x187   :  { %v299_v32 = vpop.permute.xlu0 %298  ;;  %v317_v47 = vpop.permute.xlu2 %316 }
 0x188   :  { %v321_v36 = vperm.slane %v299_v32, %v1450_v34  ;;  %v327_v53 = vperm.slane %v317_v47, %v1450_v34 }
 0x18a   :  { %v329_v41 = vsel %vm328_vm2, %v321_v36, %v320_v39 }
 0x18b   :  { %v331_v43 = vsel %vm330_vm3, %v322_v42, %v329_v41 }
 0x18c   :  { %v333_v45 = vsel %vm332_vm4, %v323_v2, %v331_v43 }
 0x18d   :  { %v308_v40 = vpop.permute.xlu1 %307 }
 0x18e   :  { %v324_v44 = vperm.slane %v308_v40, %v1450_v34 }
 0x190   :  { %v335_v49 = vsel %vm334_vm5, %v324_v44, %v333_v45 }
 0x191   :  { %v337_v54 = vsel %vm336_vm6, %v325_v50, %v335_v49 }
 0x196   :  { %v314_v51 = vpop.permute.xlu1 %313 }
 0x197   :  { %v326_v52 = vperm.slane %v314_v51, %v1450_v34 }
 0x199   :  { %v339_v56 = vsel %vm338_vm7, %v326_v52, %v337_v54 }
 0x19a   :  { %v341_v57 = vsel %vm340_vm8, %v327_v53, %v339_v56 }
 0x19b   :  { %v344_v58 = vsel %vm343_vm9, %v341_v57, -inf }
 0x19c   :  { %345 = vmax.xlane.f32.xlu1 %v344_v58 }
 0x20f   :  { %v346_v59 = vpop.xlane.xlu1 %345 }
 0x210   :  { %v349_v61 = vperm.slane %v346_v59, 1  ;;  %v348_v62 = vperm.slane %v346_v59, 0  ;;  %v351_v1 = vperm.slane %v346_v59, 3  ;;  %v350_v3 = vperm.slane %v346_v59, 2 }
 0x211   :  { %v353_v11 = vperm.slane %v346_v59, 5  ;;  %v352_v13 = vperm.slane %v346_v59, 4  ;;  %v355_v20 = vperm.slane %v346_v59, 7  ;;  %v354_v23 = vperm.slane %v346_v59, 6 }
 0x212   :  { %v365_v63 = vsub.f32 %v279_v15, %v349_v61  ;;  %v364_v0 = vsub.f32 %v278_v10, %v348_v62  ;;  %v367_v7 = vsub.f32 %v281_v19, %v351_v1  ;;  %v366_v8 = vsub.f32 %v1437_v14, %v350_v3 }
 0x213   :  { %v369_v10 = vsub.f32 %v283_v25, %v353_v11  ;;  %v368_v15 = vsub.f32 %v1440_v18, %v352_v13  ;;  %v371_v30 = vsub.f32 %v1446_v28, %v355_v20  ;;  %v370_v31 = vsub.f32 %v1443_v24, %v354_v23 }
 0x214   :  { %v374_v4 = vmul.f32 1.442695, %v365_v63  ;;  %v372_v6 = vmul.f32 1.442695, %v364_v0  ;;  %v378_v9 = vmul.f32 1.442695, %v367_v7 }
 0x215   :  { %v376_v12 = vmul.f32 1.442695, %v366_v8  ;;  %v382_v19 = vmul.f32 1.442695, %v369_v10  ;;  %v380_v14 = vmul.f32 1.442695, %v368_v15 }
 0x216   :  { %1237 = vpow2.f32 %v374_v4  ;;  %v386_v25 = vmul.f32 1.442695, %v371_v30  ;;  %v384_v32 = vmul.f32 1.442695, %v370_v31 }
 0x217   :  { %1239 = vpow2.f32 %v372_v6 }
 0x218   :  { %1241 = vpow2.f32 %v378_v9 }
 0x219   :  { %1243 = vpow2.f32 %v376_v12 }
 0x21a   :  { %1245 = vpow2.f32 %v382_v19 }
 0x21b   :  { %1247 = vpow2.f32 %v380_v14 }
 0x21c   :  { %v1469_v16 = vpop.eup %1237  ;;  %1249 = vpow2.f32 %v386_v25 }
 0x21d   :  { %v1471_v17 = vpop.eup %1239  ;;  %400 = vperm.xlu0 %1211, %v1469_v16   ;;  %1251 = vpow2.f32 %v384_v32 }
 0x21e   :  { %397 = vperm.xlu2 %1210, %v1471_v17   ;;  %v1476_v27 = vpop.eup %1241 }
 0x21f   :  { %v1244_v29 = vpop.eup %1243 }
 0x220   :  { %v1246_v36 = vpop.eup %1245 }
 0x221   :  { %v1248_v18 = vpop.eup %1247 }
 0x222   :  { %v1250_v38 = vpop.eup %1249 }
 0x223   :  { %v1252_v39 = vpop.eup %1251 }
 0x225   :  { %406 = vperm.xlu0 %1211, %v1476_v27  }
 0x226   :  { %403 = vperm.xlu2 %1210, %v1244_v29  }
 0x22d   :  { %412 = vperm.xlu0 %1211, %v1246_v36  }
 0x22e   :  { %409 = vperm.xlu2 %1210, %v1248_v18  }
 0x235   :  { %418 = vperm.xlu0 %1211, %v1250_v38  }
 0x236   :  { %415 = vperm.xlu2 %1210, %v1252_v39  }
 0x23e   :  { %1213 = vset.pattern.permute.xlu2 %v1366_v5 }
 0x278   :  { %v398_v40 = vpop.permute.xlu2 %397 }
 0x279   :  { %v420_v44 = vperm.slane %v398_v40, %v1450_v34 }
 0x280   :  { %v404_v28 = vpop.permute.xlu2 %403 }
 0x281   :  { %v422_v47 = vperm.slane %v404_v28, %v1450_v34 }
 0x288   :  { %v410_v43 = vpop.permute.xlu2 %409 }
 0x289   :  { %v424_v53 = vperm.slane %v410_v43, %v1450_v34 }
 0x28f   :  { %v401_v41 = vpop.permute.xlu0 %400 }
 0x290   :  { %v421_v24 = vperm.slane %v401_v41, %v1450_v34  ;;  %v416_v54 = vpop.permute.xlu2 %415 }
 0x291   :  { %v426_v58 = vperm.slane %v416_v54, %v1450_v34 }
 0x292   :  { %v428_v2 = vsel %vm328_vm2, %v421_v24, %v420_v44 }
 0x293   :  { %v429_v50 = vsel %vm330_vm3, %v422_v47, %v428_v2  ;;  %v1112_v2 = vld [vmem:[%s1613_s6 + $0x10] sm:$0xff] }
 0x297   :  { %v407_v42 = vpop.permute.xlu0 %406 }
 0x298   :  { %v423_v45 = vperm.slane %v407_v42, %v1450_v34 }
 0x29a   :  { %v430_v51 = vsel %vm332_vm4, %v423_v45, %v429_v50 }
 0x29b   :  { %v431_v56 = vsel %vm334_vm5, %v424_v53, %v430_v51 }
 0x29f   :  { %v413_v49 = vpop.permute.xlu0 %412 }
 0x2a0   :  { %v425_v52 = vperm.slane %v413_v49, %v1450_v34 }
 0x2a2   :  { %v432_v57 = vsel %vm336_vm6, %v425_v52, %v431_v56 }
 0x2a3   :  { %v433_v62 = vsel %vm338_vm7, %v426_v58, %v432_v57 }
 0x2a7   :  { %v419_v59 = vpop.permute.xlu0 %418 }
 0x2a8   :  { %v427_v61 = vperm.slane %v419_v59, %v1450_v34 }
 0x2aa   :  { %v434_v63 = vsel %vm340_vm8, %v427_v61, %v433_v62 }
 0x2ab   :  { %v436_v0 = vsel %vm343_vm9, %v434_v63, 0.0 }
 0x2ac   :  { %437 = vadd.xlane.f32.xlu2 %v436_v0 }
 0x31f   :  { %v438_v1 = vpop.xlane.xlu2 %437 }
 0x320   :  { %1253 = vrcp.f32 %v438_v1 }
 0x326   :  { %v1254_v3 = vpop.eup %1253 }
 0x327   :  { %v442_v4 = vperm.slane %v1254_v3, 1  ;;  %v441_v6 = vperm.slane %v1254_v3, 0  ;;  %v446_v9 = vperm.slane %v1254_v3, 5  ;;  %v443_v34 = vperm.slane %v1254_v3, 2 }
 0x328   :  { %v448_v13 = vperm.slane %v1254_v3, 7  ;;  %v444_v10 = vperm.slane %v1254_v3, 3  ;;  %v445_v20 = vperm.slane %v1254_v3, 4 }
 0x329   :  { %v458_v7 = vmul.f32 %v1469_v16, %v442_v4  ;;  %v457_v8 = vmul.f32 %v1471_v17, %v441_v6  ;;  %v462_v11 = vmul.f32 %v1246_v36, %v446_v9  ;;  %v459_v12 = vmul.f32 %v1244_v29, %v443_v34 }
 0x32a   :  { %v464_v15 = vmul.f32 %v1250_v38, %v448_v13  ;;  %v460_v19 = vmul.f32 %v1476_v27, %v444_v10  ;;  %v461_v14 = vmul.f32 %v1248_v18, %v445_v20  ;;  %v447_v16 = vperm.slane %v1254_v3, 6 }
 0x32b   :  { %472 = vperm.xlu1 %1212, %v458_v7   ;;  %467 = vperm.xlu0 %1211, %v457_v8  }
 0x32c   :  { %v463_v17 = vmul.f32 %v1252_v39, %v447_v16 }
 0x333   :  { %492 = vperm.xlu1 %1212, %v462_v11   ;;  %477 = vperm.xlu0 %1211, %v459_v12  }
 0x33b   :  { %502 = vperm.xlu1 %1212, %v464_v15   ;;  %482 = vperm.xlu0 %1211, %v460_v19  }
 0x343   :  { %487 = vperm.xlu0 %1211, %v461_v14  }
 0x34b   :  { %497 = vperm.xlu0 %1211, %v463_v17  }
 0x39d   :  { %v473_v23 = vpop.permute.xlu1 %472  ;;  %v468_v30 = vpop.permute.xlu0 %467 }
 0x39e   :  { %v506_v29 = vmul.f32 %v473_v23, %v1414_v37  ;;  %v505_v32 = vmul.f32 %v468_v30, %v1405_v26  ;;  %v1113_v26 = vld [vmem:[%s1613_s6 + $0x18] sm:$0xff] }
 0x39f   :  { %628 = vmatpush.bf16.msra.mxu1 %v1113_v26 }
 0x3a0   :  { %v520_v27 = vsel %vm186_vm1, %v506_v29, 0.0  ;;  %v513_v38 = vsel %vm186_vm1, %v505_v32, 0.0 }
 0x3a1   :  { %v521_v41 = vrot.slane %v520_v27, 4  ;;  %v514_v39 = vrot.slane %v513_v38, 4 }
 0x3a3   :  { %v522_v45 = vadd.f32 %v521_v41, %v520_v27  ;;  %v515_v47 = vadd.f32 %v514_v39, %v513_v38  ;;  %629 = vmatpush.bf16.msra.mxu1 %v1112_v2  ;;  %v1110_v2 = vld [vmem:[%s1613_s6] sm:$0xff] }
 0x3a5   :  { %v493_v31 = vpop.permute.xlu1 %492  ;;  %v478_v25 = vpop.permute.xlu0 %477  ;;  %v523_v52 = vrot.slane %v522_v45, 2  ;;  %v516_v53 = vrot.slane %v515_v47, 2 }
 0x3a6   :  { %v507_v36 = vmul.f32 %v478_v25, %v1409_v33  ;;  %v510_v43 = vmul.f32 %v493_v31, %v1423_v48 }
 0x3a7   :  { %v524_v63 = vadd.f32 %v523_v52, %v522_v45  ;;  %v517_v0 = vadd.f32 %v516_v53, %v515_v47  ;;  %v1550_v53 = vadd.s32 24, %v1366_v5 }
 0x3a8   :  { %v527_v18 = vsel %vm186_vm1, %v507_v36, 0.0 }
 0x3a9   :  { %v528_v24 = vrot.slane %v527_v18, 4  ;;  %v525_v34 = vrot.slane %v524_v63, 1  ;;  %v518_v11 = vrot.slane %v517_v0, 1 }
 0x3ab   :  { %v529_v48 = vadd.f32 %v528_v24, %v527_v18  ;;  %v526_v17 = vadd.f32 %v525_v34, %v524_v63  ;;  %v519_v23 = vadd.f32 %v518_v11, %v517_v0 }
 0x3ad   :  { %v483_v40 = vpop.permute.xlu0 %482  ;;  %v503_v28 = vpop.permute.xlu1 %502  ;;  %v530_v57 = vrot.slane %v529_v48, 2  ;;  %v577_v38 = vsel %vm328_vm2, %v526_v17, %v519_v23 }
 0x3ae   :  { %v508_v42 = vmul.f32 %v483_v40, %v1420_v46  ;;  %v512_v37 = vmul.f32 %v503_v28, %v1433_v60  ;;  %v548_v46 = vsel %vm186_vm1, %v510_v43, 0.0  ;;  %v1111_v60 = vld [vmem:[%s1613_s6 + $0x8] sm:$0xff]  ;;  %s1312_s6 = smov [#allocation6]  }
 0x3af   :  { %v549_v54 = vrot.slane %v548_v46, 4  ;;  %630 = vmatpush.bf16.msra.mxu1 %v1111_v60  ;;  %v531_v3 = vadd.f32 %v530_v57, %v529_v48  ;;  %v1540_v48 = vadd.s32 8, %v1366_v5  ;;  %s1037_s10 = sshll.u32 %s1312_s6, 4  ;;  %s1038_s10 = int_to_ptr.vmem [resolvable:$true] %s1037_s10 }
 0x3b0   :  { %v534_v33 = vsel %vm186_vm1, %v508_v42, 0.0  ;;  %v562_v50 = vsel %vm186_vm1, %v512_v37, 0.0 }
 0x3b1   :  { %v535_v44 = vrot.slane %v534_v33, 4  ;;  %v563_v58 = vrot.slane %v562_v50, 4  ;;  %v550_v1 = vadd.f32 %v549_v54, %v548_v46  ;;  %v532_v13 = vrot.slane %v531_v3, 1  ;;  %1214 = vset.pattern.permute.xlu1 %v1540_v48 }
 0x3b3   :  { %v536_v49 = vadd.f32 %v535_v44, %v534_v33  ;;  %v564_v6 = vadd.f32 %v563_v58, %v562_v50  ;;  %v551_v12 = vrot.slane %v550_v1, 2  ;;  %v533_v31 = vadd.f32 %v532_v13, %v531_v3  ;;  %631 = vmatpush.bf16.msra.mxu1 %v1110_v2 }
 0x3b5   :  { %v488_v51 = vpop.permute.xlu0 %487  ;;  %v537_v59 = vrot.slane %v536_v49, 2  ;;  %v565_v15 = vrot.slane %v564_v6, 2  ;;  %v552_v30 = vadd.f32 %v551_v12, %v550_v1  ;;  %v578_v18 = vsel %vm330_vm3, %v533_v31, %v577_v38 }
 0x3b6   :  { %v509_v56 = vmul.f32 %v488_v51, %v1412_v35 }
 0x3b7   :  { %v538_v7 = vadd.f32 %v537_v59, %v536_v49  ;;  %v566_v29 = vadd.f32 %v565_v15, %v564_v6  ;;  %v1543_v49 = vadd.s32 16, %v1366_v5 }
 0x3b8   :  { %v541_v61 = vsel %vm186_vm1, %v509_v56, 0.0 }
 0x3b9   :  { %v542_v62 = vrot.slane %v541_v61, 4  ;;  %v539_v19 = vrot.slane %v538_v7, 1  ;;  %v567_v41 = vrot.slane %v566_v29, 1  ;;  %1215 = vset.pattern.permute.xlu0 %v1543_v49 }
 0x3bb   :  { %v543_v4 = vadd.f32 %v542_v62, %v541_v61  ;;  %v540_v32 = vadd.f32 %v539_v19, %v538_v7  ;;  %v568_v26 = vadd.f32 %v567_v41, %v566_v29  ;;  %v1115_v62 = vld [vmem:[#allocation3] sm:$0xff]  }
 0x3bc   :  { %v1116_v63 = vunpack.c.l.bf16 %v1115_v62  ;;  %v1117_v0 = vunpack.c.h.bf16 %v1115_v62 }
 0x3bd   :  { %v544_v8 = vrot.slane %v543_v4, 2  ;;  %v498_v9 = vpop.permute.xlu0 %497  ;;  %v579_v39 = vsel %vm332_vm4, %v540_v32, %v578_v18 }
 0x3be   :  { %v511_v35 = vmul.f32 %v498_v9, %v1429_v55  ;;  %v553_v55 = vrot.slane %v552_v30, 1  ;;  %v1178_v9 = vld [vmem:[#allocation3 + $0x8] sm:$0xff]  }
 0x3bf   :  { %v545_v10 = vadd.f32 %v544_v8, %v543_v4  ;;  %v1120_v34 = vunpack.c.l.bf16 %v1178_v9  ;;  %v1121_v12 = vunpack.c.h.bf16 %v1178_v9 }
 0x3c0   :  { %v555_v20 = vsel %vm186_vm1, %v511_v35, 0.0  ;;  %v554_v43 = vadd.f32 %v553_v55, %v552_v30 }
 0x3c1   :  { %v546_v14 = vrot.slane %v545_v10, 1  ;;  %v556_v16 = vrot.slane %v555_v20, 4 }
 0x3c3   :  { %v557_v25 = vadd.f32 %v556_v16, %v555_v20  ;;  %v547_v36 = vadd.f32 %v546_v14, %v545_v10  ;;  %v1179_v14 = vld [vmem:[#allocation3 + $0x10] sm:$0xff]   ;;  %v1180_v16 = vld [vmem:[#allocation3 + $0x18] sm:$0xff]  }
 0x3c4   :  { %v1125_v17 = vunpack.c.h.bf16 %v1179_v14  ;;  %v1124_v23 = vunpack.c.l.bf16 %v1179_v14  ;;  %v1128_v31 = vunpack.c.l.bf16 %v1180_v16  ;;  %v1183_v14 = vld [vmem:[#allocation3 + $0x30] sm:$0xff]  }
 0x3c5   :  { %v558_v27 = vrot.slane %v557_v25, 2  ;;  %v580_v42 = vsel %vm334_vm5, %v547_v36, %v579_v39  ;;  %v1129_v36 = vunpack.c.h.bf16 %v1180_v16  ;;  %v1140_v16 = vunpack.c.l.bf16 %v1183_v14 }
 0x3c6   :  { %v581_v33 = vsel %vm336_vm6, %v554_v43, %v580_v42 }
 0x3c7   :  { %v559_v40 = vadd.f32 %v558_v27, %v557_v25 }
 0x3c9   :  { %v560_v28 = vrot.slane %v559_v40, 1 }
 0x3cb   :  { %v561_v24 = vadd.f32 %v560_v28, %v559_v40 }
 0x3cd   :  { %v582_v37 = vsel %vm338_vm7, %v561_v24, %v581_v33  ;;  %v1181_v24 = vld [vmem:[#allocation3 + $0x20] sm:$0xff]  }
 0x3ce   :  { %v583_v44 = vsel %vm340_vm8, %v568_v26, %v582_v37  ;;  %v1132_v37 = vunpack.c.l.bf16 %v1181_v24  ;;  %v1133_v2 = vunpack.c.h.bf16 %v1181_v24 }
 0x3cf   :  { %584 = vrot.lane.b32.xlu0 %v583_v44, %s1311_s30 }
 0x441   :  { %v585_v45 = vpop.permute.xlu0 %584 }
 0x442   :  { %v587_v47 = vsel %vm186_vm1, %v1396_v21, %v585_v45 }
 0x443   :  { %v588_v46 = vpack.c.bf16 %v587_v47, %v587_v47 }
 0x445   :  { %1101 = vmatmul.msk.bf16.vlgmr.msra.gmra.mxu1 %vm111_vm0, %v588_v46 }
 0x4c2   :  { %v633_v50 = vpop.f32.mrf.mxu1 }
 0x4c3   :  { %v637_v51 = vmul.f32 %v633_v50, %v1401_v22 }
 0x4c5   :  { %638 = vst.msk [vmem:[#allocation2] sm:$0xff] %vm186_vm1, %v637_v51 }
 0x4ca   :  { %v635_v60 = vpop.f32.mrf.mxu1 }
 0x4cc   :  { %v639_v21 = vld [vmem:[#allocation2] sm:$0xff] }
 0x4cd   :  { %v704_v52 = vperm.slane %v639_v21, 0  ;;  %v754_v54 = vperm.slane %v639_v21, 2  ;;  %v729_v56 = vperm.slane %v639_v21, 1  ;;  %v779_v22 = vperm.slane %v639_v21, 3 }
 0x4ce   :  { %v804_v57 = vperm.slane %v639_v21, 4  ;;  %v1559_v58 = vperm.slane %v639_v21, 5  ;;  %v1565_v59 = vperm.slane %v639_v21, 6  ;;  %v879_v61 = vperm.slane %v639_v21, 7 }
 0x4cf   :  { %721 = vperm.xlu0 %1215, %v704_v52   ;;  %715 = vperm.xlu1 %1214, %v704_v52  }
 0x4d0   :  { %709 = vperm.xlu2 %1213, %v704_v52  }
 0x4d7   :  { %1218 = vset.pattern.permute.xlu0 %v1540_v48  ;;  %1216 = vset.pattern.permute.xlu1 %v1550_v53 }
 0x4d8   :  { %759 = vperm.xlu2 %1213, %v754_v54  }
 0x4df   :  { %740 = vperm.xlu0 %1218, %v729_v56   ;;  %727 = vperm.xlu1 %1216, %v704_v52  }
 0x4e0   :  { %1220 = vset.pattern.permute.xlu2 %v1543_v49 }
 0x4e7   :  { %790 = vperm.xlu0 %1218, %v779_v22   ;;  %1217 = vset.pattern.permute.xlu1 %v1366_v5 }
 0x4e8   :  { %746 = vperm.xlu2 %1220, %v729_v56  }
 0x4ef   :  { %815 = vperm.xlu0 %1218, %v804_v57   ;;  %734 = vperm.xlu1 %1217, %v729_v56  }
 0x4f0   :  { %771 = vperm.xlu2 %1220, %v754_v54  }
 0x4f7   :  { %1224 = vset.pattern.permute.xlu0 %v1366_v5  ;;  %1219 = vset.pattern.permute.xlu1 %v1540_v48 }
 0x4f8   :  { %1222 = vset.pattern.permute.xlu2 %v1550_v53 }
 0x4ff   :  { %834 = vperm.xlu0 %1224, %v1559_v58   ;;  %765 = vperm.xlu1 %1219, %v754_v54  }
 0x500   :  { %752 = vperm.xlu2 %1222, %v729_v56  }
 0x507   :  { %1229 = vset.pattern.permute.xlu0 %v1540_v48  ;;  %1221 = vset.pattern.permute.xlu1 %v1366_v5 }
 0x508   :  { %1225 = vset.pattern.permute.xlu2 %v1540_v48 }
 0x50f   :  { %865 = vperm.xlu0 %1229, %v1565_v59   ;;  %784 = vperm.xlu1 %1221, %v779_v22  }
 0x510   :  { %840 = vperm.xlu2 %1225, %v1559_v58  }
 0x517   :  { %1234 = vset.pattern.permute.xlu0 %v1550_v53  ;;  %809 = vperm.xlu1 %1221, %v804_v57  }
 0x518   :  { %1227 = vset.pattern.permute.xlu2 %v1543_v49 }
 0x51f   :  { %827 = vperm.xlu0 %1234, %v804_v57   ;;  %1223 = vset.pattern.permute.xlu1 %v1543_v49 }
 0x520   :  { %821 = vperm.xlu2 %1227, %v804_v57  }
 0x527   :  { %902 = vperm.xlu0 %1234, %v879_v61   ;;  %796 = vperm.xlu1 %1223, %v779_v22  }
 0x528   :  { %1230 = vset.pattern.permute.xlu2 %v1550_v53 }
 0x52a   :  { %v710_v1 = vpop.permute.xlu2 %709 }
 0x52b   :  { %v904_v4 = vmul.f32 %v1116_v63, %v710_v1 }
 0x52f   :  { %1226 = vset.pattern.permute.xlu1 %v1550_v53 }
 0x530   :  { %802 = vperm.xlu2 %1230, %v779_v22   ;;  %v1182_v22 = vld [vmem:[#allocation3 + $0x28] sm:$0xff]  }
 0x532   :  { %v760_v8 = vpop.permute.xlu2 %759 }
 0x537   :  { %777 = vperm.xlu1 %1226, %v754_v54  }
 0x538   :  { %1232 = vset.pattern.permute.xlu2 %v1366_v5 }
 0x53f   :  { %1228 = vset.pattern.permute.xlu1 %v1366_v5 }
 0x540   :  { %884 = vperm.xlu2 %1232, %v879_v61  }
 0x541   :  { %v716_v3 = vpop.permute.xlu1 %715  ;;  %v722_v11 = vpop.permute.xlu0 %721 }
 0x542   :  { %v905_v6 = vmul.f32 %v1117_v0, %v716_v3  ;;  %v906_v35 = vmul.f32 %v1120_v34, %v722_v11  ;;  %v747_v5 = vpop.permute.xlu2 %746 }
 0x543   :  { %v910_v55 = vmul.f32 %v1128_v31, %v747_v5  ;;  %v1185_v31 = vld [vmem:[#allocation3 + $0x40] sm:$0xff]  }
 0x544   :  { %v936_v7 = vadd.f32 %v905_v6, %v904_v4 }
 0x546   :  { %v937_v15 = vadd.f32 %v936_v7, %v906_v35 }
 0x547   :  { %859 = vperm.xlu1 %1228, %v1565_v59  }
 0x548   :  { %1235 = vset.pattern.permute.xlu2 %v1543_v49 }
 0x54a   :  { %v772_v20 = vpop.permute.xlu2 %771 }
 0x54f   :  { %1231 = vset.pattern.permute.xlu1 %v1543_v49 }
 0x550   :  { %871 = vperm.xlu2 %1235, %v1565_v59  }
 0x551   :  { %v728_v13 = vpop.permute.xlu1 %727  ;;  %v741_v30 = vpop.permute.xlu0 %740 }
 0x552   :  { %v907_v10 = vmul.f32 %v1121_v12, %v728_v13  ;;  %v909_v32 = vmul.f32 %v1125_v17, %v741_v30  ;;  %v1184_v17 = vld [vmem:[#allocation3 + $0x38] sm:$0xff]   ;;  %v1141_v30 = vunpack.c.h.bf16 %v1183_v14 }
 0x553   :  { %v1145_v24 = vunpack.c.h.bf16 %v1184_v17 }
 0x554   :  { %v938_v19 = vadd.f32 %v937_v15, %v907_v10 }
 0x556   :  { %v939_v25 = vrot.slane %v938_v19, 4 }
 0x557   :  { %846 = vperm.xlu1 %1231, %v1559_v58  }
 0x558   :  { %896 = vperm.xlu2 %1235, %v879_v61   ;;  %v940_v18 = vadd.f32 %v939_v25, %v938_v19  ;;  %v1144_v25 = vunpack.c.l.bf16 %v1184_v17 }
 0x55a   :  { %v753_v38 = vpop.permute.xlu2 %752  ;;  %v941_v28 = vrot.slane %v940_v18, 2 }
 0x55b   :  { %v911_v41 = vmul.f32 %v1129_v36, %v753_v38  ;;  %v1149_v38 = vunpack.c.h.bf16 %v1185_v31 }
 0x55c   :  { %v942_v26 = vadd.f32 %v941_v28, %v940_v18 }
 0x55e   :  { %v943_v45 = vrot.slane %v942_v26, 1 }
 0x55f   :  { %1233 = vset.pattern.permute.xlu1 %v1540_v48  ;;  %v912_v48 = vmul.f32 %v1132_v37, %v760_v8  ;;  %v1187_v37 = vld [vmem:[#allocation3 + $0x50] sm:$0xff]  }
 0x560   :  { %v944_v51 = vadd.f32 %v943_v45, %v942_v26  ;;  %v1192_v45 = vld [vmem:[#allocation3 + $0x78] sm:$0xff]  }
 0x561   :  { %v735_v29 = vpop.permute.xlu1 %734 }
 0x562   :  { %v908_v27 = vmul.f32 %v1124_v23, %v735_v29  ;;  %v1148_v29 = vunpack.c.l.bf16 %v1185_v31 }
 0x564   :  { %v945_v40 = vadd.f32 %v909_v32, %v908_v27  ;;  %v1191_v32 = vld [vmem:[#allocation3 + $0x70] sm:$0xff]  }
 0x565   :  { %v1173_v27 = vunpack.c.h.bf16 %v1191_v32  ;;  %v1172_v28 = vunpack.c.l.bf16 %v1191_v32 }
 0x566   :  { %v946_v39 = vadd.f32 %v945_v40, %v910_v55 }
 0x567   :  { %890 = vperm.xlu1 %1233, %v879_v61   ;;  %v1137_v61 = vunpack.c.h.bf16 %v1182_v22 }
 0x568   :  { %v947_v42 = vadd.f32 %v946_v39, %v911_v41  ;;  %v1186_v41 = vld [vmem:[#allocation3 + $0x48] sm:$0xff]  }
 0x56a   :  { %v948_v43 = vrot.slane %v947_v42, 4  ;;  %v841_v9 = vpop.permute.xlu2 %840 }
 0x56c   :  { %v949_v33 = vadd.f32 %v948_v43, %v947_v42 }
 0x56e   :  { %v950_v44 = vrot.slane %v949_v33, 2 }
 0x56f   :  { %1236 = vset.pattern.permute.xlu1 %v1550_v53  ;;  %v1136_v53 = vunpack.c.l.bf16 %v1182_v22 }
 0x570   :  { %v951_v47 = vadd.f32 %v950_v44, %v949_v33  ;;  %v1152_v44 = vunpack.c.l.bf16 %v1186_v41 }
 0x571   :  { %v766_v46 = vpop.permute.xlu1 %765  ;;  %v914_v62 = vmul.f32 %v1136_v53, %v772_v20  ;;  %v1177_v53 = vunpack.c.h.bf16 %v1192_v45 }
 0x572   :  { %v952_v49 = vrot.slane %v951_v47, 1  ;;  %v913_v50 = vmul.f32 %v1133_v2, %v766_v46  ;;  %v1153_v2 = vunpack.c.h.bf16 %v1186_v41 }
 0x574   :  { %v953_v60 = vadd.f32 %v952_v49, %v951_v47  ;;  %v954_v21 = vadd.f32 %v913_v50, %v912_v48  ;;  %v1176_v48 = vunpack.c.l.bf16 %v1192_v45  ;;  %v1188_v49 = vld [vmem:[#allocation3 + $0x58] sm:$0xff]   ;;  %v1156_v50 = vunpack.c.l.bf16 %v1187_v37 }
 0x576   :  { %v1017_v52 = vsel %vm328_vm2, %v953_v60, %v944_v51  ;;  %v955_v1 = vadd.f32 %v954_v21, %v914_v62  ;;  %v1157_v21 = vunpack.c.h.bf16 %v1187_v37 }
 0x577   :  { %852 = vperm.xlu1 %1236, %v1559_v58   ;;  %v791_v58 = vpop.permute.xlu0 %790 }
 0x578   :  { %v917_v40 = vmul.f32 %v1141_v30, %v791_v58  ;;  %v1161_v58 = vunpack.c.h.bf16 %v1188_v49 }
 0x57a   :  { %v822_v12 = vpop.permute.xlu2 %821 }
 0x57b   :  { %v922_v22 = vmul.f32 %v1152_v44, %v822_v12  ;;  %v1190_v12 = vld [vmem:[#allocation3 + $0x68] sm:$0xff]  }
 0x57f   :  { %877 = vperm.xlu1 %1236, %v1565_v59   ;;  %v816_v35 = vpop.permute.xlu0 %815 }
 0x580   :  { %v921_v33 = vmul.f32 %v1149_v38, %v816_v35 }
 0x581   :  { %v785_v54 = vpop.permute.xlu1 %784 }
 0x582   :  { %v916_v36 = vmul.f32 %v1140_v16, %v785_v54 }
 0x584   :  { %v963_v43 = vadd.f32 %v917_v40, %v916_v36 }
 0x587   :  { %v835_v13 = vpop.permute.xlu0 %834 }
 0x589   :  { %v810_v56 = vpop.permute.xlu1 %809 }
 0x58a   :  { %v803_v5 = vpop.permute.xlu2 %802  ;;  %v920_v42 = vmul.f32 %v1148_v29, %v810_v56  ;;  %v1168_v29 = vunpack.c.l.bf16 %v1190_v12 }
 0x58c   :  { %v972_v51 = vadd.f32 %v921_v33, %v920_v42 }
 0x58f   :  { %v1591_v19 = vpop.permute.xlu0 %865 }
 0x597   :  { %v828_v55 = vpop.permute.xlu0 %827 }
 0x598   :  { %v923_v56 = vmul.f32 %v1153_v2, %v828_v55  ;;  %v1169_v55 = vunpack.c.h.bf16 %v1190_v12 }
 0x599   :  { %v797_v57 = vpop.permute.xlu1 %796 }
 0x59a   :  { %v885_v15 = vpop.permute.xlu2 %884  ;;  %v918_v39 = vmul.f32 %v1144_v25, %v797_v57  ;;  %v1160_v57 = vunpack.c.l.bf16 %v1188_v49 }
 0x59b   :  { %v932_v46 = vmul.f32 %v1172_v28, %v885_v15 }
 0x59c   :  { %v964_v47 = vadd.f32 %v963_v43, %v918_v39 }
 0x5a9   :  { %v778_v63 = vpop.permute.xlu1 %777 }
 0x5aa   :  { %v915_v0 = vmul.f32 %v1137_v61, %v778_v63  ;;  %v1593_v23 = vpop.permute.xlu2 %871  ;;  %v924_v63 = vmul.f32 %v1156_v50, %v835_v13 }
 0x5ab   :  { %v930_v40 = vmul.f32 %v1168_v29, %v1593_v23 }
 0x5ac   :  { %v956_v3 = vadd.f32 %v955_v1, %v915_v0  ;;  %v973_v0 = vadd.f32 %v972_v51, %v922_v22  ;;  %v903_v1 = vpop.permute.xlu0 %902 }
 0x5ae   :  { %v957_v4 = vrot.slane %v956_v3, 4 }
 0x5b0   :  { %v958_v6 = vadd.f32 %v957_v4, %v956_v3  ;;  %v925_v3 = vmul.f32 %v1157_v21, %v841_v9  ;;  %v1189_v4 = vld [vmem:[#allocation3 + $0x60] sm:$0xff]  }
 0x5b1   :  { %v1165_v15 = vunpack.c.h.bf16 %v1189_v4 }
 0x5b2   :  { %v959_v7 = vrot.slane %v958_v6, 2  ;;  %v897_v60 = vpop.permute.xlu2 %896 }
 0x5b3   :  { %v934_v62 = vmul.f32 %v1176_v48, %v897_v60  ;;  %v929_v9 = vmul.f32 %v1165_v15, %v1591_v19 }
 0x5b4   :  { %v960_v8 = vadd.f32 %v959_v7, %v958_v6  ;;  %v974_v7 = vadd.f32 %v973_v0, %v923_v56 }
 0x5b6   :  { %v961_v34 = vrot.slane %v960_v8, 1  ;;  %v975_v17 = vrot.slane %v974_v7, 4 }
 0x5b8   :  { %v962_v11 = vadd.f32 %v961_v34, %v960_v8  ;;  %v1164_v8 = vunpack.c.l.bf16 %v1189_v4 }
 0x5b9   :  { %v1589_v10 = vpop.permute.xlu1 %859 }
 0x5ba   :  { %v1587_v59 = vsel %vm330_vm3, %v962_v11, %v1017_v52  ;;  %v919_v52 = vmul.f32 %v1145_v24, %v803_v5  ;;  %v935_v11 = vmul.f32 %v1177_v53, %v903_v1  ;;  %v981_v5 = vadd.f32 %v925_v3, %v924_v63 }
 0x5bb   :  { %v928_v30 = vmul.f32 %v1164_v8, %v1589_v10 }
 0x5bc   :  { %v965_v61 = vadd.f32 %v964_v47, %v919_v52 }
 0x5be   :  { %v966_v35 = vrot.slane %v965_v61, 4 }
 0x5c0   :  { %v967_v25 = vadd.f32 %v966_v35, %v965_v61 }
 0x5c9   :  { %v847_v20 = vpop.permute.xlu1 %846 }
 0x5ca   :  { %v926_v34 = vmul.f32 %v1160_v57, %v847_v20  ;;  %v976_v20 = vadd.f32 %v975_v17, %v974_v7 }
 0x5cc   :  { %v982_v13 = vadd.f32 %v981_v5, %v926_v34  ;;  %v977_v42 = vrot.slane %v976_v20, 2 }
 0x5ce   :  { %v978_v44 = vadd.f32 %v977_v42, %v976_v20 }
 0x5d0   :  { %v979_v49 = vrot.slane %v978_v44, 1 }
 0x5d9   :  { %v891_v18 = vpop.permute.xlu1 %890 }
 0x5da   :  { %v933_v26 = vmul.f32 %v1173_v27, %v891_v18  ;;  %v990_v27 = vadd.f32 %v929_v9, %v928_v30  ;;  %v968_v18 = vrot.slane %v967_v25, 2 }
 0x5dc   :  { %v999_v54 = vadd.f32 %v933_v26, %v932_v46  ;;  %v991_v24 = vadd.f32 %v990_v27, %v930_v40  ;;  %v969_v26 = vadd.f32 %v968_v18, %v967_v25 }
 0x5de   :  { %v1000_v6 = vadd.f32 %v999_v54, %v934_v62  ;;  %v970_v45 = vrot.slane %v969_v26, 1  ;;  %v980_v54 = vadd.f32 %v979_v49, %v978_v44 }
 0x5e0   :  { %v1001_v14 = vadd.f32 %v1000_v6, %v935_v11  ;;  %v971_v23 = vadd.f32 %v970_v45, %v969_v26 }
 0x5e2   :  { %v1002_v36 = vrot.slane %v1001_v14, 4  ;;  %v1021_v52 = vsel %vm332_vm4, %v971_v23, %v1587_v59 }
 0x5e3   :  { %v1023_v57 = vsel %vm334_vm5, %v980_v54, %v1021_v52 }
 0x5e4   :  { %v1003_v39 = vadd.f32 %v1002_v36, %v1001_v14 }
 0x5e6   :  { %v1004_v19 = vrot.slane %v1003_v39, 2 }
 0x5e8   :  { %v1005_v46 = vadd.f32 %v1004_v19, %v1003_v39 }
 0x5e9   :  { %v853_v16 = vpop.permute.xlu1 %852 }
 0x5ea   :  { %v927_v31 = vmul.f32 %v1161_v58, %v853_v16  ;;  %v1006_v21 = vrot.slane %v1005_v46, 1 }
 0x5ec   :  { %v983_v32 = vadd.f32 %v982_v13, %v927_v31  ;;  %v1007_v53 = vadd.f32 %v1006_v21, %v1005_v46 }
 0x5ee   :  { %v984_v38 = vrot.slane %v983_v32, 4 }
 0x5f0   :  { %v985_v41 = vadd.f32 %v984_v38, %v983_v32 }
 0x5f1   :  { %v878_v28 = vpop.permute.xlu1 %877 }
 0x5f2   :  { %v986_v10 = vrot.slane %v985_v41, 2  ;;  %v931_v43 = vmul.f32 %v1169_v55, %v878_v28 }
 0x5f4   :  { %v992_v33 = vadd.f32 %v991_v24, %v931_v43  ;;  %v987_v37 = vadd.f32 %v986_v10, %v985_v41 }
 0x5f6   :  { %v993_v2 = vrot.slane %v992_v33, 4  ;;  %v988_v48 = vrot.slane %v987_v37, 1 }
 0x5f8   :  { %v994_v47 = vadd.f32 %v993_v2, %v992_v33  ;;  %v989_v60 = vadd.f32 %v988_v48, %v987_v37 }
 0x5fa   :  { %v995_v50 = vrot.slane %v994_v47, 2  ;;  %v1025_v61 = vsel %vm336_vm6, %v989_v60, %v1023_v57 }
 0x5fc   :  { %v996_v51 = vadd.f32 %v995_v50, %v994_v47 }
 0x5fe   :  { %v997_v22 = vrot.slane %v996_v51, 1 }
 0x600   :  { %v998_v56 = vadd.f32 %v997_v22, %v996_v51 }
 0x602   :  { %v1027_v62 = vsel %vm338_vm7, %v998_v56, %v1025_v61 }
 0x603   :  { %v1029_v59 = vsel %vm340_vm8, %v1007_v53, %v1027_v62 }
 0x604   :  { %1031 = vst [vmem:[#allocation6] sm:$0xff] %v1029_v59 }
 0x605   :  { %1042 = dma.vmem_to_hbm [thread:$0]  %s1038_s10, 128, %s1040_s12, [#allocation5]  }
 0x606   :  { %1305 = dma.done.wait [#allocation5], 128  }
 0x607   :  { %1306 = vsyncadd [#allocation5], 4294967168 }
 0x608   :  { %1047 = vsyncpa [#allocation4], 1 }
 0x609   :  { %1048 = vsyncpa [#allocation5], 1 }

</bundles_post_ra>
